<compile_context>
chip_gen: v7x
topology: tpu7x:2x2x1
jax: 0.10.0
libtpu: 0.0.40
codegen_flags: <defaults>
</compile_context>

<pallas_src>
import functools
import math

import jax
import jax.numpy as jnp
from jax.experimental import pallas as pl
from jax.experimental.pallas import tpu as pltpu

LANES = 128
SUBLANES = 8
SUB_ROWS = 256               # rows per in-kernel sub-chunk (bounds vreg live ranges)


def _tpu_generation() -> int:
    """Best-effort TPU generation (5, 6, 7, ...); 0 if unknown."""
    try:
        kind = jax.devices()[0].device_kind.lower()
    except Exception:
        return 0
    import re
    m = re.search(r"v(\d+)", kind)
    if m:
        return int(m.group(1))
    for ch in kind:
        if ch.isdigit():
            return int(ch)
    return 0


_GEN = _tpu_generation()
# 2-way core split only on multi-TensorCore chips (v7x+); pure waste on v5e/v6e.
_NUM_CORE_SPLIT_DEFAULT = 2 if _GEN >= 7 else 1
# 8192-row tiles (4 MiB/input/buffer) on v6e; 4096 elsewhere (v7x: 64 MiB VMEM per TC).
_MAX_ROW_TILE_DEFAULT = 8192 if _GEN == 6 else 4096
_VMEM_LIMIT_BYTES = (48 << 20) if _GEN == 6 else (32 << 20)


def _focal_loss_kernel(out_ref, tgt_ref, loss_ref, *,
                       alpha, gamma, smooth,
                       sub_rows, n_full, tail_rows,
                       tiles_per_core, last_tile, valid_rows_last,
                       has_partial, needs_dup_gate):
    c = pl.program_id(0)          # "parallel" core-split axis
    j = pl.program_id(1)          # "arbitrary" reduction axis
    tile_idx = c * tiles_per_core + j

    @pl.when(j == 0)
    def _init():
        loss_ref[...] = jnp.zeros_like(loss_ref)

    log_smooth = math.log(smooth)
    log_1m_smooth = math.log1p(-smooth)

    def chunk_loss(x, t):
        # Three EUP ops per element (exp, log1p, exp); everything else stays on the VPU.
        e = jnp.exp(-jnp.abs(x))
        sp = jnp.log1p(e)                                  # log(1 + exp(-|x|))
        log_sig_x = -(jnp.maximum(-x, 0.0) + sp)           # log(sigmoid(x))
        log_sig_nx = -(jnp.maximum(x, 0.0) + sp)           # F.logsigmoid(-x)

        # sigmoid(x) via EUP exp (no VALU divide), then the module's clip.
        prob = jnp.clip(jnp.exp(log_sig_x), smooth, 1.0 - smooth)
        # log(clip(prob, s, 1-s)) == clip(log(sigmoid(x)), log(s), log1p(-s))
        log_prob = jnp.clip(log_sig_x, log_smooth, log_1m_smooth)

        one_m_p = 1.0 - prob
        if gamma == 2.0:          # static branch: squaring stays on the VPU, no pow
            pos_w = one_m_p * one_m_p
            neg_w = prob * prob
        else:
            pos_w = jnp.power(one_m_p, gamma)
            neg_w = jnp.power(prob, gamma)

        is_pos = t == 1.0
        is_neg = t == 0.0
        # Fused branches: pick weight & log-term first, then a single multiply.
        w = jnp.where(is_pos, pos_w, jnp.where(is_neg, alpha * neg_w, 0.0))
        lg = jnp.where(is_pos, log_prob, log_sig_nx)
        return -(w * lg)

    def accumulate(valid_rows):
        # valid_rows: None -> full tile (fast path, no masking);
        #             int  -> zero rows >= valid_rows (single partial trailing tile only).
        def chunk(row0, nrows, acc):
            x = out_ref[pl.ds(row0, nrows), :].astype(jnp.float32)
            t = tgt_ref[pl.ds(row0, nrows), :].astype(jnp.float32)
            loss = chunk_loss(x, t)
            if valid_rows is not None:
                ridx = row0 + jax.lax.broadcasted_iota(jnp.int32, loss.shape, 0)
                loss = jnp.where(ridx < valid_rows, loss, 0.0)
            # Vreg-shaped partial sum: pure VPU adds, no cross-lane reduce per step.
            return acc + loss.reshape(-1, SUBLANES, LANES).sum(axis=0)

        acc = jnp.zeros((SUBLANES, LANES), jnp.float32)
        if n_full == 1:
            acc = chunk(0, sub_rows, acc)
        elif n_full > 1:
            def body(i, a):
                r0 = pl.multiple_of(i * sub_rows, sub_rows)
                return chunk(r0, sub_rows, a)
            acc = jax.lax.fori_loop(0, n_full, body, acc)
        if tail_rows:
            acc = chunk(n_full * sub_rows, tail_rows, acc)
        loss_ref[...] += acc

    if has_partial:
        # Tiles strictly before the last one are always full -> unmasked fast path.
        @pl.when(tile_idx < last_tile)
        def _full_tiles():
            accumulate(None)

        # The single partial trailing tile: row-masked path (garbage rows zeroed).
        @pl.when(tile_idx == last_tile)
        def _partial_tile():
            accumulate(valid_rows_last)
        # tile_idx > last_tile (duplicated clamped tile from the core split): skipped.
    elif needs_dup_gate:
        @pl.when(tile_idx <= last_tile)
        def _gated():
            accumulate(None)
    else:
        accumulate(None)


def binary_focal_loss(output, target, *, alpha=3.0, gamma=2.0, smooth=1e-6,
                      reduction='mean', _max_row_tile=None, _num_core_split=None):
    """Pallas TPU implementation of BinaryFocalLoss.forward (ignore_index=None)."""
    assert output.shape == target.shape
    assert reduction in ('none', 'mean', 'sum')
    total = output.size

    max_row_tile = _MAX_ROW_TILE_DEFAULT if _max_row_tile is None else int(_max_row_tile)
    num_core_split = (_NUM_CORE_SPLIT_DEFAULT if _num_core_split is None
                      else int(_num_core_split))
    assert max_row_tile % SUBLANES == 0 and max_row_tile > 0
    assert num_core_split >= 1

    if target.dtype == jnp.bool_:
        target = target.astype(jnp.float32)   # sentinel 2.0 must be representable

    out_flat = jnp.ravel(output)
    tgt_flat = jnp.ravel(target)

    # Pad (a copy) only when the flat length is not already (8*128)-aligned.  The target
    # pad uses a sentinel (2.0, exactly representable in f32/bf16/int) so padded elements
    # fall through the t==1 / t==0 selects to zero -- no in-kernel index mask needed.
    chunk = SUBLANES * LANES
    rem = total % chunk
    if rem:
        pad = chunk - rem
        out_flat = jnp.pad(out_flat, (0, pad))                        # logits pad: 0.0
        tgt_flat = jnp.pad(tgt_flat, (0, pad), constant_values=2)     # sentinel target
    m = out_flat.shape[0] // LANES                                    # multiple of 8
    out2d = out_flat.reshape(m, LANES)
    tgt2d = tgt_flat.reshape(m, LANES)

    row_tile = min(max_row_tile, m)
    n_tiles = int(pl.cdiv(m, row_tile))
    tiles_per_core = int(pl.cdiv(n_tiles, num_core_split))
    last_tile = n_tiles - 1
    valid_rows_last = m - last_tile * row_tile          # real rows in the last tile
    has_partial = valid_rows_last != row_tile           # last tile extends past the array
    needs_dup_gate = num_core_split * tiles_per_core != n_tiles   # duplicated clamped tile

    sub_rows = min(SUB_ROWS, row_tile)                  # multiple of 8
    n_full = row_tile // sub_rows
    tail_rows = row_tile - n_full * sub_rows            # multiple of 8, < sub_rows

    kernel = functools.partial(
        _focal_loss_kernel,
        alpha=float(alpha), gamma=float(gamma), smooth=float(smooth),
        sub_rows=sub_rows, n_full=n_full, tail_rows=tail_rows,
        tiles_per_core=tiles_per_core, last_tile=last_tile,
        valid_rows_last=valid_rows_last,
        has_partial=has_partial, needs_dup_gate=needs_dup_gate)

    def in_map(c, j):
        # Clamp so a duplicated trailing tile never issues an out-of-bounds DMA; its
        # contribution is skipped by the whole-tile pl.when gate in the kernel.
        return (jnp.minimum(c * tiles_per_core + j, last_tile), 0)

    elem_bytes = out2d.dtype.itemsize + tgt2d.dtype.itemsize

    partials = pl.pallas_call(
        kernel,
        out_shape=jax.ShapeDtypeStruct((num_core_split, SUBLANES, LANES), jnp.float32),
        grid_spec=pltpu.PrefetchScalarGridSpec(
            num_scalar_prefetch=0,
            grid=(num_core_split, tiles_per_core),
            in_specs=[
                pl.BlockSpec((row_tile, LANES), in_map),
                pl.BlockSpec((row_tile, LANES), in_map),
            ],
            # Per-core (8,128) partial-sum slab, resident across the reduction axis.
            out_specs=pl.BlockSpec((None, SUBLANES, LANES), lambda c, j: (c, 0, 0)),
        ),
        compiler_params=pltpu.CompilerParams(
            dimension_semantics=("parallel", "arbitrary"),
            vmem_limit_bytes=_VMEM_LIMIT_BYTES),
        cost_estimate=pl.CostEstimate(
            flops=25 * total,
            transcendentals=3 * total,
            bytes_accessed=total * elem_bytes
            + num_core_split * SUBLANES * LANES * 4),
    )(out2d, tgt2d)

    s = jnp.sum(partials)
    if reduction == 'sum':
        return s
    # NOTE: matches the PyTorch module, where reduction='none' also returns the mean.
    return s / jnp.float32(total)


def _reference(output, target, alpha=3.0, gamma=2.0, smooth=1e-6, reduction='mean'):
    prob = jax.nn.sigmoid(output)
    prob = jnp.clip(prob, smooth, 1.0 - smooth)
    pos_mask = (target == 1.0).astype(jnp.float32)
    neg_mask = (target == 0.0).astype(jnp.float32)
    pos_loss = -pos_mask * (1.0 - prob) ** gamma * jnp.log(prob)
    neg_loss = -alpha * neg_mask * prob ** gamma * jax.nn.log_sigmoid(-output)
    loss = pos_loss + neg_loss
    return jnp.sum(loss) if reduction == 'sum' else jnp.mean(loss)


if __name__ == "__main__":
    key = jax.random.PRNGKey(0)
    k1, k2, k3, k4, k5, k6, k7, k8 = jax.random.split(key, 8)

    # 1) Aligned NCHW case (batch=2, channels=4, 16x16): single full tile, fast path.
    x1 = jax.random.normal(k1, (2, 4, 16, 16), dtype=jnp.float32)
    t1 = jax.random.bernoulli(k2, p=0.3, shape=(2, 4, 16, 16)).astype(jnp.float32)
    got1 = jax.block_until_ready(binary_focal_loss(x1, t1, reduction='mean'))
    ref1 = _reference(x1, t1, reduction='mean')
    assert jnp.allclose(got1, ref1, rtol=1e-5, atol=1e-6), (got1, ref1)

    # 2) Ragged (210 elements): exercises sentinel lane padding + 'sum' reduction.
    x2 = jax.random.normal(k3, (2, 3, 7, 5), dtype=jnp.float32)
    t2 = jax.random.bernoulli(k4, p=0.4, shape=(2, 3, 7, 5)).astype(jnp.float32)
    got2 = jax.block_until_ready(binary_focal_loss(x2, t2, reduction='sum'))
    ref2 = _reference(x2, t2, reduction='sum')
    assert jnp.allclose(got2, ref2, rtol=1e-5, atol=1e-6), (got2, ref2)

    # 3) Forced tiny tiles + 2-way core split: exercises the partial-tile masked path and
    #    the duplicated-tile pl.when gate regardless of the chip generation.
    x3 = jax.random.normal(k5, (4, 25, 41), dtype=jnp.float32)
    t3 = jax.random.bernoulli(k6, p=0.5, shape=(4, 25, 41)).astype(jnp.float32)
    got3 = jax.block_until_ready(
        binary_focal_loss(x3, t3, reduction='mean',
                          _max_row_tile=16, _num_core_split=2))
    ref3 = _reference(x3, t3, reduction='mean')
    assert jnp.allclose(got3, ref3, rtol=1e-4, atol=1e-6), (got3, ref3)

    # 4) 520x128 input: exercises the fori_loop sub-chunking (2 full 256-row chunks)
    #    plus the 8-row tail chunk within a single tile.
    x4 = jax.random.normal(k7, (520, 128), dtype=jnp.float32)
    t4 = jax.random.bernoulli(k8, p=0.25, shape=(520, 128)).astype(jnp.float32)
    got4 = jax.block_until_ready(binary_focal_loss(x4, t4, reduction='mean'))
    ref4 = _reference(x4, t4, reduction='mean')
    assert jnp.allclose(got4, ref4, rtol=1e-4, atol=1e-6), (got4, ref4)

    print("KERNEL_OK")
</pallas_src>

<mosaic_0001>
module attributes {stable_mosaic.version = 11 : i64} {
  func.func @_focal_loss_kernel(%arg0: i32, %arg1: i32, %arg2: memref<16x128xf32, #tpu.memory_space<vmem>>, %arg3: memref<16x128xf32, #tpu.memory_space<vmem>>, %arg4: memref<1x8x128xf32, #tpu.memory_space<vmem>>) attributes {dimension_semantics = [#tpu.dimension_semantics<parallel>, #tpu.dimension_semantics<arbitrary>], iteration_bounds = array<i64: 1, 1>, scalar_prefetch = 0 : i64, scratch_operands = 0 : i64, tpu.core_type = #tpu.core_type<tc>, window_params = [{transform_indices = @transform_0, window_bounds = array<i64: 16, 128>}, {transform_indices = @transform_1, window_bounds = array<i64: 16, 128>}, {transform_indices = @transform_2, window_bounds = array<i64: 1, 8, 128>}]} {
    %c0_i32 = arith.constant 0 : i32
    %0 = arith.cmpi eq, %arg1, %c0_i32 : i32
    %1 = arith.extui %0 : i1 to i32
    %c0_i32_0 = arith.constant 0 : i32
    %2 = arith.cmpi ne, %1, %c0_i32_0 : i32
    scf.if %2 {
      %cst_27 = arith.constant 0.000000e+00 : f32
      %58 = vector.broadcast %cst_27 : f32 to vector<8x128xf32>
      %c0_28 = arith.constant 0 : index
      %c0_29 = arith.constant 0 : index
      %c0_30 = arith.constant 0 : index
      %59 = vector.load %arg4[%c0_28, %c0_29, %c0_30] : memref<1x8x128xf32, #tpu.memory_space<vmem>>, vector<1x8x128xf32>
      %60 = vector.shape_cast %59 : vector<1x8x128xf32> to vector<8x128xf32>
      %61 = vector.shape_cast %58 : vector<8x128xf32> to vector<1x8x128xf32>
      tpu.vector_store %arg4[%c0_28, %c0_29, %c0_30], %61 {strides = array<i32>} : memref<1x8x128xf32, #tpu.memory_space<vmem>>, vector<1x8x128xf32>,
    } else {
    }
    %cst = arith.constant 0.000000e+00 : f32
    %3 = vector.broadcast %cst : f32 to vector<8x128xf32>
    %c0 = arith.constant 0 : index
    %c0_1 = arith.constant 0 : index
    %4 = vector.load %arg2[%c0, %c0_1] : memref<16x128xf32, #tpu.memory_space<vmem>>, vector<16x128xf32>
    %c0_2 = arith.constant 0 : index
    %c0_3 = arith.constant 0 : index
    %5 = vector.load %arg3[%c0_2, %c0_3] : memref<16x128xf32, #tpu.memory_space<vmem>>, vector<16x128xf32>
    %6 = math.absf %4 : vector<16x128xf32>
    %cst_4 = arith.constant 0.000000e+00 : f32
    %7 = vector.broadcast %cst_4 : f32 to vector<16x128xf32>
    %8 = arith.subf %7, %6 : vector<16x128xf32>
    %9 = math.exp %8 : vector<16x128xf32>
    %10 = math.log1p %9 : vector<16x128xf32>
    %cst_5 = arith.constant 0.000000e+00 : f32
    %11 = vector.broadcast %cst_5 : f32 to vector<16x128xf32>
    %12 = arith.subf %11, %4 : vector<16x128xf32>
    %cst_6 = arith.constant 0.000000e+00 : f32
    %13 = vector.broadcast %cst_6 : f32 to vector<16x128xf32>
    %14 = arith.maximumf %12, %13 : vector<16x128xf32>
    %15 = arith.addf %14, %10 : vector<16x128xf32>
    %cst_7 = arith.constant 0.000000e+00 : f32
    %16 = vector.broadcast %cst_7 : f32 to vector<16x128xf32>
    %17 = arith.subf %16, %15 : vector<16x128xf32>
    %cst_8 = arith.constant 0.000000e+00 : f32
    %18 = vector.broadcast %cst_8 : f32 to vector<16x128xf32>
    %19 = arith.maximumf %4, %18 : vector<16x128xf32>
    %20 = arith.addf %19, %10 : vector<16x128xf32>
    %cst_9 = arith.constant 0.000000e+00 : f32
    %21 = vector.broadcast %cst_9 : f32 to vector<16x128xf32>
    %22 = arith.subf %21, %20 : vector<16x128xf32>
    %23 = math.exp %17 : vector<16x128xf32>
    %cst_10 = arith.constant 9.99999997E-7 : f32
    %cst_11 = arith.constant 0.999998986 : f32
    %24 = vector.broadcast %cst_10 : f32 to vector<16x128xf32>
    %25 = arith.maximumf %24, %23 : vector<16x128xf32>
    %26 = vector.broadcast %cst_11 : f32 to vector<16x128xf32>
    %27 = arith.minimumf %26, %25 : vector<16x128xf32>
    %cst_12 = arith.constant -13.8155107 : f32
    %cst_13 = arith.constant -1.00000045E-6 : f32
    %28 = vector.broadcast %cst_12 : f32 to vector<16x128xf32>
    %29 = arith.maximumf %28, %17 : vector<16x128xf32>
    %30 = vector.broadcast %cst_13 : f32 to vector<16x128xf32>
    %31 = arith.minimumf %30, %29 : vector<16x128xf32>
    %cst_14 = arith.constant 1.000000e+00 : f32
    %32 = vector.broadcast %cst_14 : f32 to vector<16x128xf32>
    %33 = arith.subf %32, %27 : vector<16x128xf32>
    %34 = arith.mulf %33, %33 : vector<16x128xf32>
    %35 = arith.mulf %27, %27 : vector<16x128xf32>
    %cst_15 = arith.constant 1.000000e+00 : f32
    %36 = vector.broadcast %cst_15 : f32 to vector<16x128xf32>
    %37 = arith.cmpf oeq, %5, %36 : vector<16x128xf32>
    %cst_16 = arith.constant 0.000000e+00 : f32
    %38 = vector.broadcast %cst_16 : f32 to vector<16x128xf32>
    %39 = arith.cmpf oeq, %5, %38 : vector<16x128xf32>
    %cst_17 = arith.constant 3.000000e+00 : f32
    %40 = vector.broadcast %cst_17 : f32 to vector<16x128xf32>
    %41 = arith.mulf %40, %35 : vector<16x128xf32>
    %cst_18 = arith.constant 0.000000e+00 : f32
    %42 = vector.broadcast %cst_18 : f32 to vector<16x128xf32>
    %43 = arith.select %39, %41, %42 : vector<16x128xi1>, vector<16x128xf32>
    %44 = arith.select %37, %34, %43 : vector<16x128xi1>, vector<16x128xf32>
    %45 = arith.select %37, %31, %22 : vector<16x128xi1>, vector<16x128xf32>
    %46 = arith.mulf %44, %45 : vector<16x128xf32>
    %cst_19 = arith.constant 0.000000e+00 : f32
    %47 = vector.broadcast %cst_19 : f32 to vector<16x128xf32>
    %48 = arith.subf %47, %46 : vector<16x128xf32>
    %49 = vector.shape_cast %48 : vector<16x128xf32> to vector<2x8x128xf32>
    %cst_20 = arith.constant dense<0.000000e+00> : vector<8x128xf32>
    %50 = vector.multi_reduction <add>, %49, %cst_20 [0] : vector<2x8x128xf32> to vector<8x128xf32>
    %51 = arith.addf %3, %50 : vector<8x128xf32>
    %c0_21 = arith.constant 0 : index
    %c0_22 = arith.constant 0 : index
    %c0_23 = arith.constant 0 : index
    %52 = vector.load %arg4[%c0_21, %c0_22, %c0_23] : memref<1x8x128xf32, #tpu.memory_space<vmem>>, vector<1x8x128xf32>
    %53 = vector.shape_cast %52 : vector<1x8x128xf32> to vector<8x128xf32>
    %54 = arith.addf %53, %51 : vector<8x128xf32>
    %c0_24 = arith.constant 0 : index
    %c0_25 = arith.constant 0 : index
    %c0_26 = arith.constant 0 : index
    %55 = vector.load %arg4[%c0_24, %c0_25, %c0_26] : memref<1x8x128xf32, #tpu.memory_space<vmem>>, vector<1x8x128xf32>
    %56 = vector.shape_cast %55 : vector<1x8x128xf32> to vector<8x128xf32>
    %57 = vector.shape_cast %54 : vector<8x128xf32> to vector<1x8x128xf32>
    tpu.vector_store %arg4[%c0_24, %c0_25, %c0_26], %57 {strides = array<i32>} : memref<1x8x128xf32, #tpu.memory_space<vmem>>, vector<1x8x128xf32>,
    return
  }
  func.func @transform_0(%arg0: i32, %arg1: i32) -> (i32, i32) {
    %c1_i32 = arith.constant 1 : i32
    %0 = arith.muli %arg0, %c1_i32 : i32
    %1 = arith.addi %0, %arg1 : i32
    %c0_i32 = arith.constant 0 : i32
    %2 = arith.minsi %1, %c0_i32 : i32
    %c0_i32_0 = arith.constant 0 : i32
    %c0_i32_1 = arith.constant 0 : i32
    return %2, %c0_i32_0 : i32, i32
  }
  func.func @transform_1(%arg0: i32, %arg1: i32) -> (i32, i32) {
    %c1_i32 = arith.constant 1 : i32
    %0 = arith.muli %arg0, %c1_i32 : i32
    %1 = arith.addi %0, %arg1 : i32
    %c0_i32 = arith.constant 0 : i32
    %2 = arith.minsi %1, %c0_i32 : i32
    %c0_i32_0 = arith.constant 0 : i32
    %c0_i32_1 = arith.constant 0 : i32
    return %2, %c0_i32_0 : i32, i32
  }
  func.func @transform_2(%arg0: i32, %arg1: i32) -> (i32, i32, i32) {
    %c0_i32 = arith.constant 0 : i32
    %c0_i32_0 = arith.constant 0 : i32
    %c0_i32_1 = arith.constant 0 : i32
    return %arg0, %c0_i32, %c0_i32_0 : i32, i32, i32
  }
}

</mosaic_0001>

<bundles_post_ra>
// kernel: tpu_custom_call.1
= control target key start
LH: loop header
LB: loop body
LE: loop exit
PB: predicated region body
PF: predicated region fallthrough
CT: control target
= control target key end

     0   :  { %7 = vsyncpa [#allocation3], 0  ;;  %s316_s0 = inlined_call_operand.hbm [shape: f32[16,128], index: 0, kind: input, shape index: {}]   ;;  %s317_s1 = inlined_call_operand.hbm [shape: f32[16,128], index: 1, kind: input, shape index: {}]   ;;  %s318_s2 = inlined_call_operand.hbm [shape: f32[1,8,128], index: 2, kind: output, shape index: {}]  }
   0x1   :  { %8 = vsyncpa [#allocation6], 0 }
   0x2   :  { %9 = vsyncpa [#allocation4], 0  ;;  %s258_s9 = smov [#allocation2]   ;;  %s186_s13 = scalar_lea.hbm %s316_s0, 256 }
   0x3   :  { %s21_s10 = sshll.u32 %s258_s9, 4  ;;  %p187_p0 = scmp.ne.s32.totalorder %s316_s0, %s186_s13  ;;  %s22_s10 = int_to_ptr.vmem [resolvable:$true] %s21_s10 }
   0x4   :  { %p190_p1 = scmp.lt.u32.totalorder %s186_s13, %s316_s0 }
   0x6   :  { %p192_p2 = pnand %p190_p1, %p187_p0 }
   0x8   :  { %195 = shalt.err (!%p192_p2)
}
   0x9   :  { %s196_s18 = scalar_lea.vmem %s22_s10, 256  ;;  %p201_p4 = scmp.lt.s32.totalorder %s22_s10, %s22_s10 }
   0xa   :  { %p197_p3 = scmp.ne.s32.totalorder %s22_s10, %s196_s18  ;;  %p202_p5 = scmp.lt.s32.totalorder %s196_s18, %s196_s18 }
   0xc   :  { %p203_p6 = por %p202_p5, %p201_p4 }
   0xe   :  { %p204_p7 = pnand %p203_p6, %p197_p3 }
  0x10   :  { %207 = shalt.err (!%p204_p7)
}
  0x11   :  { %s259_s19 = smov 128   ;;  %s260_s20 = smov 8  }
  0x12   :  { %27 = dma.hbm_to_vmem [thread:$0]  %s316_s0, 256, %s22_s10, [#allocation3], %s259_s19, %s259_s19, %s260_s20  }
  0x13   :  { %s261_s23 = smov [#allocation5]   ;;  %s208_s27 = scalar_lea.hbm %s317_s1, 256 }
  0x14   :  { %s39_s24 = sshll.u32 %s261_s23, 4  ;;  %p209_p8 = scmp.ne.s32.totalorder %s317_s1, %s208_s27  ;;  %s40_s24 = int_to_ptr.vmem [resolvable:$true] %s39_s24 }
  0x15   :  { %p212_p9 = scmp.lt.u32.totalorder %s208_s27, %s317_s1 }
  0x17   :  { %p214_p10 = pnand %p212_p9, %p209_p8 }
  0x19   :  { %217 = shalt.err (!%p214_p10)
}
  0x1a   :  { %s218_s4 = scalar_lea.vmem %s40_s24, 256  ;;  %p223_p12 = scmp.lt.s32.totalorder %s40_s24, %s40_s24 }
  0x1b   :  { %p219_p11 = scmp.ne.s32.totalorder %s40_s24, %s218_s4  ;;  %p224_p13 = scmp.lt.s32.totalorder %s218_s4, %s218_s4 }
  0x1d   :  { %p225_p0 = por %p224_p13, %p223_p12 }
  0x1f   :  { %p226_p1 = pnand %p225_p0, %p219_p11 }
  0x21   :  { %229 = shalt.err (!%p226_p1)
}
  0x22   :  { %45 = dma.hbm_to_vmem [thread:$0]  %s317_s1, 256, %s40_s24, [#allocation6], %s259_s19, %s259_s19, %s260_s20  }
  0x23   :  { %252 = dma.done.wait [#allocation3], 256  }
  0x24   :  { %253 = vsyncadd [#allocation3], 4294967040 }
  0x25   :  { %254 = dma.done.wait [#allocation6], 256  }
  0x26   :  { %255 = vsyncadd [#allocation6], 4294967040  ;;  %v65_v0 = vld [vmem:[#allocation2] sm:$0xff]  ;;  %v66_v1 = vld [vmem:[#allocation2 + $0x8] sm:$0xff]  ;;  %s262_s1 = smov [#allocation7]  }
  0x27   :  { %v69_v2 = vand.u32 2147483647, %v65_v0  ;;  %v70_v3 = vand.u32 2147483647, %v66_v1  ;;  %v95_v17 = vsub.f32 0.0, %v65_v0  ;;  %v96_v19 = vsub.f32 0.0, %v66_v1 }
  0x28   :  { %v103_v36 = vmax.f32 %v65_v0, 0.0  ;;  %v104_v37 = vmax.f32 %v66_v1, 0.0  ;;  %v67_v42 = vld [vmem:[#allocation5] sm:$0xff]  ;;  %v68_v47 = vld [vmem:[#allocation5 + $0x8] sm:$0xff]  ;;  %s154_s6 = sshll.u32 %s262_s1, 4  ;;  %s155_s6 = int_to_ptr.vmem [resolvable:$true] %s154_s6 }
  0x29   :  { %v71_v4 = vsub.f32 0.0, %v69_v2  ;;  %v72_v5 = vsub.f32 0.0, %v70_v3  ;;  %v97_v23 = vmax.f32 %v95_v17, 0.0  ;;  %v98_v26 = vmax.f32 %v96_v19, 0.0  ;;  %s230_s7 = scalar_lea.vmem %s155_s6, 128  ;;  %p235_p3 = scmp.lt.s32.totalorder %s155_s6, %s155_s6 }
  0x2a   :  { %vm127_vm2 = vcmp.eq.f32.partialorder %v67_v42, 1.0  ;;  %vm128_vm3 = vcmp.eq.f32.partialorder %v68_v47, 1.0  ;;  %vm129_vm4 = vcmp.eq.f32.partialorder %v67_v42, 0.0  ;;  %vm130_vm5 = vcmp.eq.f32.partialorder %v68_v47, 0.0  ;;  %p231_p2 = scmp.ne.s32.totalorder %s155_s6, %s230_s7  ;;  %p236_p4 = scmp.lt.s32.totalorder %s230_s7, %s230_s7 }
  0x2b   :  { %v73_v6 = vmul.f32 1.442695, %v71_v4  ;;  %v75_v7 = vmul.f32 1.442695, %v72_v5 }
  0x2c   :  { %p237_p5 = por %p236_p4, %p235_p3 }
  0x2d   :  { %174 = vpow2.f32 %v73_v6 }
  0x2e   :  { %176 = vpow2.f32 %v75_v7  ;;  %p238_p6 = pnand %p237_p5, %p231_p2 }
  0x37   :  { %v175_v8 = vpop.eup %174 }
  0x38   :  { %v177_v9 = vpop.eup %176  ;;  %v77_v10 = vadd.f32 1.0, %v175_v8  ;;  %v80_v12 = vmul.f32 -0.5, %v175_v8  ;;  %v83_v15 = vand.u32 2147483647, %v175_v8 }
  0x39   :  { %v86_v11 = vadd.f32 1.0, %v177_v9  ;;  %v89_v13 = vmul.f32 -0.5, %v177_v9  ;;  %v92_v18 = vand.u32 2147483647, %v177_v9 }
  0x3a   :  { %178 = vlog2.f32 %v77_v10  ;;  %v81_v14 = vadd.f32 1.0, %v80_v12  ;;  %vm84_vm0 = vcmp.lt.f32.partialorder %v83_v15, 0.0004427343 }
  0x3b   :  { %180 = vlog2.f32 %v86_v11  ;;  %v90_v16 = vadd.f32 1.0, %v89_v13  ;;  %vm93_vm1 = vcmp.lt.f32.partialorder %v92_v18, 0.0004427343 }
  0x3c   :  { %v82_v20 = vmul.f32 %v175_v8, %v81_v14 }
  0x3d   :  { %v91_v22 = vmul.f32 %v177_v9, %v90_v16 }
  0x44   :  { %v179_v21 = vpop.eup %178 }
  0x45   :  { %v181_v24 = vpop.eup %180  ;;  %v79_v25 = vmul.f32 0.6931472, %v179_v21 }
  0x46   :  { %v88_v27 = vmul.f32 0.6931472, %v181_v24 }
  0x47   :  { %v85_v28 = vsel %vm84_vm0, %v82_v20, %v79_v25 }
  0x48   :  { %v94_v29 = vsel %vm93_vm1, %v91_v22, %v88_v27  ;;  %v99_v30 = vadd.f32 %v97_v23, %v85_v28  ;;  %v105_v39 = vadd.f32 %v103_v36, %v85_v28 }
  0x49   :  { %v100_v31 = vadd.f32 %v98_v26, %v94_v29  ;;  %v106_v43 = vadd.f32 %v104_v37, %v94_v29 }
  0x4a   :  { %v101_v32 = vsub.f32 0.0, %v99_v30  ;;  %v107_v49 = vsub.f32 0.0, %v105_v39 }
  0x4b   :  { %v102_v33 = vsub.f32 0.0, %v100_v31  ;;  %v108_v52 = vsub.f32 0.0, %v106_v43 }
  0x4c   :  { %v109_v34 = vmul.f32 1.442695, %v101_v32  ;;  %v117_v40 = vmax.f32 %v101_v32, -13.815511 }
  0x4d   :  { %v111_v35 = vmul.f32 1.442695, %v102_v33  ;;  %v118_v45 = vmax.f32 %v102_v33, -13.815511 }
  0x4e   :  { %182 = vpow2.f32 %v109_v34  ;;  %v119_v51 = vmin.f32 %v117_v40, -1.0000005e-06 }
  0x4f   :  { %184 = vpow2.f32 %v111_v35  ;;  %v120_v53 = vmin.f32 %v118_v45, -1.0000005e-06 }
  0x50   :  { %v137_v62 = vsel %vm127_vm2, %v119_v51, %v107_v49 }
  0x51   :  { %v138_v0 = vsel %vm128_vm3, %v120_v53, %v108_v52 }
  0x58   :  { %v183_v38 = vpop.eup %182 }
  0x59   :  { %v185_v41 = vpop.eup %184  ;;  %v113_v44 = vmax.f32 %v183_v38, 1e-06 }
  0x5a   :  { %v114_v46 = vmax.f32 %v185_v41, 1e-06 }
  0x5b   :  { %v115_v48 = vmin.f32 %v113_v44, 0.999999 }
  0x5c   :  { %v116_v50 = vmin.f32 %v114_v46, 0.999999 }
  0x5d   :  { %v121_v54 = vsub.f32 1.0, %v115_v48  ;;  %v125_v55 = vmul.f32 %v115_v48, %v115_v48 }
  0x5e   :  { %v122_v56 = vsub.f32 1.0, %v116_v50  ;;  %v126_v57 = vmul.f32 %v116_v50, %v116_v50 }
  0x5f   :  { %v123_v58 = vmul.f32 %v121_v54, %v121_v54  ;;  %v131_v59 = vmul.f32 3.0, %v125_v55 }
  0x60   :  { %v124_v60 = vmul.f32 %v122_v56, %v122_v56  ;;  %v132_v61 = vmul.f32 3.0, %v126_v57 }
  0x61   :  { %v133_v63 = vsel %vm129_vm4, %v131_v59, 0.0 }
  0x62   :  { %v134_v1 = vsel %vm130_vm5, %v132_v61, 0.0  ;;  %v135_v2 = vsel %vm127_vm2, %v123_v58, %v133_v63 }
  0x63   :  { %v136_v3 = vsel %vm128_vm3, %v124_v60, %v134_v1  ;;  %v139_v4 = vmul.f32 %v137_v62, %v135_v2 }
  0x64   :  { %v140_v5 = vmul.f32 %v138_v0, %v136_v3 }
  0x65   :  { %v141_v6 = vsub.f32 0.0, %v139_v4 }
  0x66   :  { %v142_v7 = vsub.f32 0.0, %v140_v5 }
  0x68   :  { %v143_v8 = vadd.f32 %v142_v7, %v141_v6 }
  0x6a   :  { %147 = vst [vmem:[#allocation7] sm:$0xff] %v143_v8 }
  0x6b   :  { %241 = shalt.err (!%p238_p6)
}
  0x6c   :  { %s242_s10 = scalar_lea.hbm %s318_s2, 128 }
  0x6d   :  { %p243_p7 = scmp.ne.s32.totalorder %s318_s2, %s242_s10  ;;  %p246_p8 = scmp.lt.u32.totalorder %s242_s10, %s318_s2 }
  0x6f   :  { %p248_p9 = pnand %p246_p8, %p243_p7 }
  0x71   :  { %251 = shalt.err (!%p248_p9)
}
  0x72   :  { %157 = dma.vmem_to_hbm [thread:$0]  %s155_s6, 128, %s318_s2, [#allocation4]  }
  0x73   :  { %256 = dma.done.wait [#allocation4], 128  }
  0x74   :  { %257 = vsyncadd [#allocation4], 4294967168 }
  0x75   :  { %161 = vsyncpa [#allocation3], 1 }
  0x76   :  { %162 = vsyncpa [#allocation6], 1 }
  0x77   :  { %163 = vsyncpa [#allocation4], 1 }

</bundles_post_ra>
